<compile_context>
chip_gen: v5e
topology: v5e:2x2
jax: 0.10.0
libtpu: 0.0.40
codegen_flags: <defaults>
</compile_context>

<pallas_src>
from functools import partial

import numpy as np
import jax
import jax.numpy as jnp
from jax.experimental import pallas as pl
from jax.experimental.pallas import tpu as pltpu


def _round_up(x, m):
    return (x + m - 1) // m * m


# ---------------------------------------------------------------------------
# Row-tiled linear:  y = x @ W + b
# ---------------------------------------------------------------------------
def _linear_kernel(x_ref, w_ref, b_ref, o_ref):
    o_ref[...] = (
        jnp.dot(x_ref[...], w_ref[...], preferred_element_type=jnp.float32)
        + b_ref[...]
    ).astype(o_ref.dtype)


def _pick_row_tile(n, cin, cout, budget_bytes=8 << 20, cap=512):
    """Row tile so double-buffered x/out tiles + the resident weight stay well
    under the scoped-VMEM default on every generation (incl. v7x's 64 MiB)."""
    weight_bytes = (cin * cout + cout) * 4
    avail = max(budget_bytes - 2 * weight_bytes, 1 << 20)
    tm = avail // (2 * 4 * (cin + cout))
    tm = max(8, (min(cap, tm) // 8) * 8)
    return min(tm, _round_up(n, 8))


def pallas_linear(x, w, b, *, block_rows=None):
    """y = x @ w + b, pipelined over row tiles; weight/bias stay VMEM-resident."""
    n, cin = x.shape
    cout = w.shape[1]
    tm = block_rows or _pick_row_tile(n, cin, cout)
    tm = min(_round_up(n, 8), _round_up(tm, 8))
    return pl.pallas_call(
        _linear_kernel,
        out_shape=jax.ShapeDtypeStruct((n, cout), x.dtype),
        grid=(pl.cdiv(n, tm),),
        in_specs=[
            pl.BlockSpec((tm, cin), lambda i: (i, 0)),
            pl.BlockSpec((cin, cout), lambda i: (0, 0)),   # resident across steps
            pl.BlockSpec((1, cout), lambda i: (0, 0)),
        ],
        out_specs=pl.BlockSpec((tm, cout), lambda i: (i, 0)),
        compiler_params=pltpu.CompilerParams(dimension_semantics=("parallel",)),
    )(x, w, b)


# ---------------------------------------------------------------------------
# Batched per-patch multi-head attention
#   qkv layout: (P, K, 3C) with channel order [q | k | v] x [head] x [head_dim]
#   output:     (P, K, C)  (lane-dense last dim = all heads concatenated)
# ---------------------------------------------------------------------------
def _attn_kernel(qkv_ref, o_ref, *, num_heads, head_dim, scale):
    C = num_heads * head_dim
    qkv = qkv_ref[...].astype(jnp.float32)                 # (TP, K, 3C)
    outs = []
    for h in range(num_heads):                             # static unroll over heads
        q = qkv[:, :, h * head_dim:(h + 1) * head_dim] * scale
        k = qkv[:, :, C + h * head_dim:C + (h + 1) * head_dim]
        v = qkv[:, :, 2 * C + h * head_dim:2 * C + (h + 1) * head_dim]
        # batched over patches, contracting last dims (no k.T materialization)
        attn = jnp.einsum("pkd,pjd->pkj", q, k,
                          preferred_element_type=jnp.float32)      # (TP, K, K)
        attn = attn - jnp.max(attn, axis=-1, keepdims=True)        # stable softmax
        attn = jnp.exp(attn)
        # approx=False keeps exact f32 parity with the reference (approx=True
        # would move the divide to the EUP at ~1e-3 accuracy).
        attn = attn * pl.reciprocal(
            jnp.sum(attn, axis=-1, keepdims=True), approx=False)
        outs.append(jnp.einsum("pkj,pjd->pkd", attn, v,
                               preferred_element_type=jnp.float32))  # (TP, K, D)
    # single lane-dense store: last dim is the full C = H*D
    o_ref[...] = jnp.concatenate(outs, axis=-1).astype(o_ref.dtype)


def _pick_patch_tile(p, k, c, budget_bytes=8 << 20, cap=128):
    per_patch = k * (3 * c + c) * 4            # fp32 in + out bytes per patch
    tp = max(1, budget_bytes // (2 * per_patch))
    return max(1, min(tp, cap, p))


def pallas_patch_attention(qkv_patches, num_heads, scale, *, patch_tile=None):
    """qkv_patches: (P, K, 3C) -> out (P, K, C)."""
    P, K, C3 = qkv_patches.shape
    C = C3 // 3
    D = C // num_heads
    tp = patch_tile or _pick_patch_tile(P, K, C)
    tp = max(1, min(tp, P))
    return pl.pallas_call(
        partial(_attn_kernel, num_heads=num_heads, head_dim=D, scale=scale),
        out_shape=jax.ShapeDtypeStruct((P, K, C), qkv_patches.dtype),
        grid=(pl.cdiv(P, tp),),
        in_specs=[pl.BlockSpec((tp, K, C3), lambda i: (i, 0, 0))],
        out_specs=pl.BlockSpec((tp, K, C), lambda i: (i, 0, 0)),
        compiler_params=pltpu.CompilerParams(dimension_semantics=("parallel",)),
    )(qkv_patches)


# ---------------------------------------------------------------------------
# Host-side glue (mirrors @torch.no_grad get_padding_and_inverse / offset2bincount)
# ---------------------------------------------------------------------------
def offset2bincount(offset):
    return np.diff(np.concatenate([[0], offset]))


def get_padding_and_inverse(offset, patch_size):
    K = patch_size
    bincount = offset2bincount(offset)
    bincount_pad = (bincount + K - 1) // K * K
    mask_pad = bincount > K
    bincount_pad = (~mask_pad) * bincount + mask_pad * bincount_pad
    _offset = np.concatenate([[0], offset])
    _offset_pad = np.concatenate([[0], np.cumsum(bincount_pad)])
    pad = np.arange(_offset_pad[-1])
    unpad = np.arange(_offset[-1])
    cu_seqlens = []
    for i in range(len(offset)):
        unpad[_offset[i]:_offset[i + 1]] += _offset_pad[i] - _offset[i]
        if bincount[i] != bincount_pad[i]:
            pad[_offset_pad[i + 1] - K + bincount[i] % K: _offset_pad[i + 1]] = \
                pad[_offset_pad[i + 1] - 2 * K + bincount[i] % K:
                    _offset_pad[i + 1] - K]
        pad[_offset_pad[i]:_offset_pad[i + 1]] -= _offset_pad[i] - _offset[i]
        cu_seqlens.append(
            np.arange(_offset_pad[i], _offset_pad[i + 1], K, dtype=np.int32))
    cu_seqlens = np.concatenate(
        cu_seqlens + [np.array([_offset_pad[-1]], dtype=np.int32)])
    return pad, unpad, cu_seqlens


# ---------------------------------------------------------------------------
# SerializedAttention forward (non-flash path; enable_rpe=False)
# ---------------------------------------------------------------------------
class SerializedAttentionPallas:
    def __init__(self, channels, num_heads, patch_size, key,
                 qkv_bias=True, qk_scale=None, order_index=0):
        assert channels % num_heads == 0
        self.channels = channels
        self.num_heads = num_heads
        self.scale = qk_scale or (channels // num_heads) ** (-0.5)
        self.order_index = order_index
        self.patch_size_max = patch_size

        k1, k2, k3, k4 = jax.random.split(key, 4)
        # Linear weights stored transposed: y = x @ W + b
        self.w_qkv = (jax.random.normal(k1, (channels, channels * 3),
                                        dtype=jnp.float32) * 0.02)
        self.b_qkv = (jax.random.normal(k2, (1, channels * 3),
                                        dtype=jnp.float32) * 0.01
                      if qkv_bias else jnp.zeros((1, channels * 3), jnp.float32))
        self.w_proj = (jax.random.normal(k3, (channels, channels),
                                         dtype=jnp.float32) * 0.02)
        self.b_proj = (jax.random.normal(k4, (1, channels),
                                         dtype=jnp.float32) * 0.01)
        # TODO(synk): enable_rpe / flash-attn varlen path not implemented
        #             (standard non-flash attention math only).

    def forward(self, feat, offset, order, inverse, *,
                block_rows=None, patch_tile=None):
        """feat: (N, C) f32; offset: (B,) int; order/inverse: (N,) int perms."""
        H = self.num_heads
        C = self.channels
        # non-flash: patch_size = min(bincount.min(), patch_size_max)
        K = int(min(offset2bincount(offset).min(), self.patch_size_max))

        pad, unpad, _cu_seqlens = get_padding_and_inverse(offset, K)
        order_pad = np.asarray(order)[pad]     # (Npad,) indices into N
        inv = unpad[np.asarray(inverse)]       # (N,)    indices into Npad

        # Gather BEFORE the qkv linear (gather commutes with a row-wise linear):
        # saves a full HBM pass over the 3x wider qkv activation.
        # TODO(synk): fully fusing these gathers into the kernels would need
        #             PrefetchScalarGridSpec + manual per-row DMA gather.
        feat_pad = jnp.take(feat, jnp.asarray(order_pad), axis=0)       # (Npad, C)

        qkv = pallas_linear(feat_pad, self.w_qkv, self.b_qkv,
                            block_rows=block_rows)                      # (Npad, 3C)
        qkv = qkv.reshape(-1, K, 3 * C)                                 # (P, K, 3C) free

        out = pallas_patch_attention(qkv, H, self.scale,
                                     patch_tile=patch_tile)             # (P, K, C)
        feat_pad_out = out.reshape(-1, C)                               # (Npad, C) free

        feat_unpad = jnp.take(feat_pad_out, jnp.asarray(inv), axis=0)   # (N, C)
        return pallas_linear(feat_unpad, self.w_proj, self.b_proj,
                             block_rows=block_rows)                     # (N, C)


# ---------------------------------------------------------------------------
# Pure-JAX reference (same math, no Pallas) for verification
# ---------------------------------------------------------------------------
def reference_forward(mod, feat, offset, order, inverse):
    H, C = mod.num_heads, mod.channels
    K = int(min(offset2bincount(offset).min(), mod.patch_size_max))
    D = C // H
    pad, unpad, _ = get_padding_and_inverse(offset, K)
    order_pad = np.asarray(order)[pad]
    inv = unpad[np.asarray(inverse)]
    qkv = feat @ mod.w_qkv + mod.b_qkv
    qkv = qkv[jnp.asarray(order_pad)]
    qkv = qkv.reshape(-1, K, 3, H, D).transpose(2, 0, 3, 1, 4)
    q, k, v = qkv[0], qkv[1], qkv[2]
    attn = jnp.einsum('phkd,phjd->phkj', q * mod.scale, k)
    attn = jax.nn.softmax(attn, axis=-1)
    o = jnp.einsum('phkj,phjd->phkd', attn, v)
    o = o.transpose(0, 2, 1, 3).reshape(-1, C)
    o = o[jnp.asarray(inv)]
    return o @ mod.w_proj + mod.b_proj


# ---------------------------------------------------------------------------
if __name__ == "__main__":
    key = jax.random.PRNGKey(0)
    k_param, k_feat, k_perm = jax.random.split(key, 3)

    channels = 32
    num_heads = 4
    patch_size = 8
    # two point-cloud segments of 150 and 230 points (offset = cumulative counts)
    offset = np.array([150, 380], dtype=np.int64)
    N = int(offset[-1])

    feat = jax.random.normal(k_feat, (N, channels), dtype=jnp.float32)
    order = np.asarray(jax.random.permutation(k_perm, N))   # serialization order
    inverse = np.argsort(order)                              # its inverse

    mod = SerializedAttentionPallas(channels, num_heads, patch_size, k_param)

    # small explicit tiles so the test exercises multi-step pipelined grids
    out = mod.forward(feat, offset, order, inverse, block_rows=128, patch_tile=16)
    out = jax.block_until_ready(out)

    ref = reference_forward(mod, feat, offset, order, inverse)
    np.testing.assert_allclose(np.asarray(out), np.asarray(ref),
                               rtol=1e-5, atol=1e-5)
    assert out.shape == (N, channels) and out.dtype == jnp.float32

    print("KERNEL_OK")
</pallas_src>

<mosaic_0001>
module attributes {stable_mosaic.version = 11 : i64} {
  func.func @_linear_kernel(%arg0: i32, %arg1: memref<128x32xf32, #tpu.memory_space<vmem>>, %arg2: memref<32x96xf32, #tpu.memory_space<vmem>>, %arg3: memref<1x96xf32, #tpu.memory_space<vmem>>, %arg4: memref<128x96xf32, #tpu.memory_space<vmem>>) attributes {dimension_semantics = [#tpu.dimension_semantics<parallel>], iteration_bounds = array<i64: 3>, scalar_prefetch = 0 : i64, scratch_operands = 0 : i64, tpu.core_type = #tpu.core_type<tc>, window_params = [{transform_indices = @transform_0, window_bounds = array<i64: 128, 32>}, {pipeline_mode = #tpu.pipeline_mode<synchronous>, transform_indices = @transform_1, window_bounds = array<i64: 32, 96>}, {pipeline_mode = #tpu.pipeline_mode<synchronous>, transform_indices = @transform_2, window_bounds = array<i64: 1, 96>}, {transform_indices = @transform_3, window_bounds = array<i64: 128, 96>}]} {
    %c0 = arith.constant 0 : index
    %c0_0 = arith.constant 0 : index
    %0 = vector.load %arg1[%c0, %c0_0] : memref<128x32xf32, #tpu.memory_space<vmem>>, vector<128x32xf32>
    %c0_1 = arith.constant 0 : index
    %c0_2 = arith.constant 0 : index
    %1 = vector.load %arg2[%c0_1, %c0_2] : memref<32x96xf32, #tpu.memory_space<vmem>>, vector<32x96xf32>
    %cst = arith.constant dense<0.000000e+00> : vector<128x96xf32>
    %2 = tpu.matmul %0, %1, %cst {dimension_numbers = #tpu.dot_dimension_numbers<[1], [0], [0], [1], [0, 0, 1, 1], [], []>} : vector<128x32xf32>, vector<32x96xf32>, vector<128x96xf32> -> vector<128x96xf32>
    %c0_3 = arith.constant 0 : index
    %c0_4 = arith.constant 0 : index
    %3 = vector.load %arg3[%c0_3, %c0_4] : memref<1x96xf32, #tpu.memory_space<vmem>>, vector<1x96xf32>
    %4 = vector.broadcast %3 : vector<1x96xf32> to vector<128x96xf32>
    %5 = arith.addf %2, %4 : vector<128x96xf32>
    %c0_5 = arith.constant 0 : index
    %c0_6 = arith.constant 0 : index
    %6 = vector.load %arg4[%c0_5, %c0_6] : memref<128x96xf32, #tpu.memory_space<vmem>>, vector<128x96xf32>
    tpu.vector_store %arg4[%c0_5, %c0_6], %5 {strides = array<i32>} : memref<128x96xf32, #tpu.memory_space<vmem>>, vector<128x96xf32>,
    return
  }
  func.func @transform_0(%arg0: i32) -> (i32, i32) {
    %c0_i32 = arith.constant 0 : i32
    %c0_i32_0 = arith.constant 0 : i32
    return %arg0, %c0_i32 : i32, i32
  }
  func.func @transform_1(%arg0: i32) -> (i32, i32) {
    %c0_i32 = arith.constant 0 : i32
    %c0_i32_0 = arith.constant 0 : i32
    %c0_i32_1 = arith.constant 0 : i32
    return %c0_i32, %c0_i32_0 : i32, i32
  }
  func.func @transform_2(%arg0: i32) -> (i32, i32) {
    %c0_i32 = arith.constant 0 : i32
    %c0_i32_0 = arith.constant 0 : i32
    %c0_i32_1 = arith.constant 0 : i32
    return %c0_i32, %c0_i32_0 : i32, i32
  }
  func.func @transform_3(%arg0: i32) -> (i32, i32) {
    %c0_i32 = arith.constant 0 : i32
    %c0_i32_0 = arith.constant 0 : i32
    return %arg0, %c0_i32 : i32, i32
  }
}

</mosaic_0001>

<bundles_post_ra>
// kernel: tpu_custom_call.1
= control target key start
LH: loop header
LB: loop body
LE: loop exit
PB: predicated region body
PF: predicated region fallthrough
CT: control target
= control target key end

     0   :  { %s461_s12 = smov 0   ;;  %s568_s0 = inlined_call_operand.vmem [shape: f32[384,32], index: 0, kind: input, shape index: {}]   ;;  %s569_s1 = inlined_call_operand.vmem [shape: f32[32,96], index: 1, kind: input, shape index: {}]   ;;  %s570_s2 = inlined_call_operand.vmem [shape: f32[1,96], index: 2, kind: input, shape index: {}]   ;;  %s571_s3 = inlined_call_operand.vmem [shape: f32[384,96], index: 3, kind: output, shape index: {}]  }
   0x1 LB: > { %s385_s13 = sadd.s32 4294967295, %s439_s12   ;;  %p389_p0 = scmp.ge.s32.totalorder %s439_s12, 1  ;;  %s439_s12 = sphi %s461_s12, %s13_s12  }
   0x2   : > { %p138_p1 = scmp.lt.s32.totalorder %s439_s12, 4 }
   0x4   : > { %p139_p2 = pnand %p389_p0, %p138_p1 }
   0x5   : > { %s390_s18 = sshll.u32 (!%p139_p2), %s385_s13, 4 }
   0x6   : > { %142 = sbr.rel (%p139_p2) target bundleno = 179 (0xb3), region = 32  ;;  %p163_p3 = scmp.lt.s32.totalorder (!%p139_p2), %s390_s18, 47 }
   0xb   : > { %v193_v0 = vld [vmem:[%s569_s1 + $0x18] sm:$0xff]  ;;  %v192_v1 = vld [vmem:[%s569_s1 + $0x10] sm:$0xff]  ;;  %v191_v2 = vld [vmem:[%s569_s1 + $0x8] sm:$0xff]  ;;  %s573_s18 = smov (!%p163_p3, %s390_s18), 47  ;;  %vm198_vm0 = vcmask 261120   ;;  %vm312_vm1 = vcmask 785408  }
   0xc   : > { %413 = vmatpush.msra.mxu2 %v193_v0  ;;  %414 = vmatpush.msra.mxu3 %v193_v0  ;;  %v190_v3 = vld [vmem:[%s569_s1] sm:$0xff]  ;;  %s391_s23 = sshll.u32 %s573_s18, 3 }
   0xd   : > { %259 = vmatpush.msra.mxu0 %v193_v0  ;;  %412 = vmatpush.msra.mxu1 %v193_v0  ;;  %s489_s26 = scalar_lea.vmem %s568_s0, %s391_s23  ;;  %v432_v20 = vld [vmem:[%s570_s2] ss:$0 sm:$0xff]  ;;  %s531_s4 = scalar_lea.vmem %s571_s3, %s391_s23 }
   0xe   : > { %416 = vmatpush.msra.mxu2 %v192_v1  ;;  %417 = vmatpush.msra.mxu3 %v192_v1  ;;  %v182_v4 = vld [vmem:[%s489_s26 + $0x40] sm:$0xff]  ;;  %v183_v8 = vld [vmem:[%s489_s26 + $0x48] sm:$0xff]  ;;  %v184_v12 = vld [vmem:[%s489_s26 + $0x50] sm:$0xff] }
   0xf   : > { %260 = vmatpush.msra.mxu0 %v192_v1  ;;  %415 = vmatpush.msra.mxu1 %v192_v1  ;;  %v186_v5 = vld [vmem:[%s489_s26 + $0x60] sm:$0xff]  ;;  %v187_v9 = vld [vmem:[%s489_s26 + $0x68] sm:$0xff]  ;;  %v188_v13 = vld [vmem:[%s489_s26 + $0x70] sm:$0xff] }
  0x10   : > { %419 = vmatpush.msra.mxu2 %v191_v2  ;;  %420 = vmatpush.msra.mxu3 %v191_v2  ;;  %v174_v6 = vld [vmem:[%s489_s26] sm:$0xff]  ;;  %v175_v10 = vld [vmem:[%s489_s26 + $0x8] sm:$0xff]  ;;  %v176_v14 = vld [vmem:[%s489_s26 + $0x10] sm:$0xff] }
  0x11   : > { %261 = vmatpush.msra.mxu0 %v191_v2  ;;  %418 = vmatpush.msra.mxu1 %v191_v2  ;;  %v178_v7 = vld [vmem:[%s489_s26 + $0x20] sm:$0xff]  ;;  %v179_v11 = vld [vmem:[%s489_s26 + $0x28] sm:$0xff]  ;;  %v180_v15 = vld [vmem:[%s489_s26 + $0x30] sm:$0xff] }
  0x12   : > { %422 = vmatpush.msra.mxu2 %v190_v3  ;;  %423 = vmatpush.msra.mxu3 %v190_v3  ;;  %v185_v16 = vld [vmem:[%s489_s26 + $0x58] sm:$0xff] }
  0x13   : > { %402 = vmatmul.msk.f32.vlgmr.msra.gmra.mxu2 %vm198_vm0, %v182_v4  ;;  %406 = vmatmul.msk.f32.vlgmr.msra.gmra.mxu3 %vm198_vm0, %v186_v5  ;;  %v189_v17 = vld [vmem:[%s489_s26 + $0x78] sm:$0xff] }
  0x14   : > { %262 = vmatpush.msra.mxu0 %v190_v3  ;;  %421 = vmatpush.msra.mxu1 %v190_v3  ;;  %v177_v18 = vld [vmem:[%s489_s26 + $0x18] sm:$0xff] }
  0x15   : > { %394 = vmatmul.msk.f32.vlgmr.msra.gmra.mxu0 %vm198_vm0, %v174_v6  ;;  %398 = vmatmul.msk.f32.vlgmr.msra.gmra.mxu1 %vm198_vm0, %v178_v7  ;;  %v181_v19 = vld [vmem:[%s489_s26 + $0x38] sm:$0xff] }
  0x1b   : > { %403 = vmatmul.msk.f32.gmra.mxu2 %vm198_vm0, %v183_v8  ;;  %407 = vmatmul.msk.f32.gmra.mxu3 %vm198_vm0, %v187_v9 }
  0x1d   : > { %395 = vmatmul.msk.f32.gmra.mxu0 %vm198_vm0, %v175_v10  ;;  %399 = vmatmul.msk.f32.gmra.mxu1 %vm198_vm0, %v179_v11 }
  0x23   : > { %404 = vmatmul.msk.f32.gmra.mxu2 %vm198_vm0, %v184_v12  ;;  %408 = vmatmul.msk.f32.gmra.mxu3 %vm198_vm0, %v188_v13 }
  0x25   : > { %396 = vmatmul.msk.f32.gmra.mxu0 %vm198_vm0, %v176_v14  ;;  %400 = vmatmul.msk.f32.gmra.mxu1 %vm198_vm0, %v180_v15 }
  0x2b   : > { %405 = vmatmul.msk.f32.gmra.mxu2 %vm198_vm0, %v185_v16  ;;  %409 = vmatmul.msk.f32.gmra.mxu3 %vm198_vm0, %v189_v17 }
  0x2d   : > { %397 = vmatmul.msk.f32.gmra.mxu0 %vm198_vm0, %v177_v18  ;;  %401 = vmatmul.msk.f32.gmra.mxu1 %vm198_vm0, %v181_v19 }
  0x92   : > { %v264_v21 = vpop.f32.mrf.mxu0  ;;  %v276_v22 = vpop.f32.mrf.mxu1 }
  0x93   : > { %v265_v23 = vadd.f32 %v432_v20, %v264_v21  ;;  %v277_v24 = vadd.f32 %v432_v20, %v276_v22 }
  0x95   : > { %313 = vst.msk [vmem:[%s531_s4] sm:$0xff] %vm312_vm1, %v265_v23 }
  0x96   : > { %317 = vst.msk [vmem:[%s531_s4 + $0x20] sm:$0xff] %vm312_vm1, %v277_v24  ;;  %v288_v25 = vpop.f32.mrf.mxu2  ;;  %v300_v26 = vpop.f32.mrf.mxu3 }
  0x97   : > { %v289_v27 = vadd.f32 %v432_v20, %v288_v25  ;;  %v301_v28 = vadd.f32 %v432_v20, %v300_v26 }
  0x99   : > { %321 = vst.msk [vmem:[%s531_s4 + $0x40] sm:$0xff] %vm312_vm1, %v289_v27 }
  0x9a   : > { %325 = vst.msk [vmem:[%s531_s4 + $0x60] sm:$0xff] %vm312_vm1, %v301_v28  ;;  %v267_v29 = vpop.f32.mrf.mxu0  ;;  %v279_v30 = vpop.f32.mrf.mxu1 }
  0x9b   : > { %v268_v31 = vadd.f32 %v432_v20, %v267_v29  ;;  %v280_v32 = vadd.f32 %v432_v20, %v279_v30 }
  0x9d   : > { %314 = vst.msk [vmem:[%s531_s4 + $0x8] sm:$0xff] %vm312_vm1, %v268_v31 }
  0x9e   : > { %318 = vst.msk [vmem:[%s531_s4 + $0x28] sm:$0xff] %vm312_vm1, %v280_v32  ;;  %v291_v33 = vpop.f32.mrf.mxu2  ;;  %v303_v34 = vpop.f32.mrf.mxu3 }
  0x9f   : > { %v292_v35 = vadd.f32 %v432_v20, %v291_v33  ;;  %v304_v36 = vadd.f32 %v432_v20, %v303_v34 }
  0xa1   : > { %322 = vst.msk [vmem:[%s531_s4 + $0x48] sm:$0xff] %vm312_vm1, %v292_v35 }
  0xa2   : > { %326 = vst.msk [vmem:[%s531_s4 + $0x68] sm:$0xff] %vm312_vm1, %v304_v36  ;;  %v270_v37 = vpop.f32.mrf.mxu0  ;;  %v282_v38 = vpop.f32.mrf.mxu1 }
  0xa3   : > { %v271_v39 = vadd.f32 %v432_v20, %v270_v37  ;;  %v283_v40 = vadd.f32 %v432_v20, %v282_v38 }
  0xa5   : > { %315 = vst.msk [vmem:[%s531_s4 + $0x10] sm:$0xff] %vm312_vm1, %v271_v39 }
  0xa6   : > { %319 = vst.msk [vmem:[%s531_s4 + $0x30] sm:$0xff] %vm312_vm1, %v283_v40  ;;  %v294_v41 = vpop.f32.mrf.mxu2  ;;  %v306_v42 = vpop.f32.mrf.mxu3 }
  0xa7   : > { %v295_v43 = vadd.f32 %v432_v20, %v294_v41  ;;  %v307_v44 = vadd.f32 %v432_v20, %v306_v42 }
  0xa9   : > { %323 = vst.msk [vmem:[%s531_s4 + $0x50] sm:$0xff] %vm312_vm1, %v295_v43 }
  0xaa   : > { %327 = vst.msk [vmem:[%s531_s4 + $0x70] sm:$0xff] %vm312_vm1, %v307_v44  ;;  %v273_v45 = vpop.f32.mrf.mxu0  ;;  %v285_v46 = vpop.f32.mrf.mxu1 }
  0xab   : > { %v274_v47 = vadd.f32 %v432_v20, %v273_v45  ;;  %v286_v48 = vadd.f32 %v432_v20, %v285_v46 }
  0xad   : > { %316 = vst.msk [vmem:[%s531_s4 + $0x18] sm:$0xff] %vm312_vm1, %v274_v47 }
  0xae   : > { %320 = vst.msk [vmem:[%s531_s4 + $0x38] sm:$0xff] %vm312_vm1, %v286_v48  ;;  %v297_v49 = vpop.f32.mrf.mxu2  ;;  %v309_v50 = vpop.f32.mrf.mxu3 }
  0xaf   : > { %v298_v51 = vadd.f32 %v432_v20, %v297_v49  ;;  %v310_v52 = vadd.f32 %v432_v20, %v309_v50 }
  0xb1   : > { %324 = vst.msk [vmem:[%s531_s4 + $0x58] sm:$0xff] %vm312_vm1, %v298_v51 }
  0xb2   : > { %328 = vst.msk [vmem:[%s531_s4 + $0x78] sm:$0xff] %vm312_vm1, %v310_v52 }
  0xb3 PF: > { %s13_s12 = sadd.s32 1, %s439_s12  }
  0xb4   : > { %p10_p4 = scmp.ge.s32.totalorder %s13_s12, 5  }
  0xb6   :  { %12 = sbr.rel (!%p10_p4) target bundleno = 1 (0x1), region = 62 }

</bundles_post_ra>
